<compile_context>
chip_gen: v6e
topology: v6e:2x2x1
jax: 0.10.0
libtpu: 0.0.40
codegen_flags: <defaults>
</compile_context>

<pallas_src>
import math

import jax
import jax.numpy as jnp
from jax.experimental import pallas as pl
from jax.experimental.pallas import tpu as pltpu

_LANES = 128
# Per-block VMEM budget: 2 inputs x 2 pipeline buffers (native dtype) + 1 f32
# accumulator block.  10 MiB -> 4096 rows @ f32/128 lanes, fits all gens.
_VMEM_BUDGET_BYTES = 10 * 1024 * 1024


def _round_up(x, m):
    return ((x + m - 1) // m) * m


def _sublane_multiple(dtype):
    bits = jnp.dtype(dtype).itemsize * 8
    return max(8, 256 // bits)  # 8 (f32) / 16 (bf16) / 32 (int8 / fp8)


def _big_as_2d(x):
    """Free (metadata-only) 2-D view of a contiguous array: NO padding copy.

    If the element count is lane-divisible we get a fully lane-dense
    (n/128, 128) view; otherwise we keep the original last dim as the lane
    dim (block last dim == full array dim, so the (8,128) rule is satisfied).
    """
    n = int(math.prod(x.shape))
    if x.ndim == 0:
        return x.reshape(1, 1), n
    if n % _LANES == 0:
        return x.reshape(n // _LANES, _LANES), n
    return x.reshape(-1, x.shape[-1]), n


def _small_tile_f32(x):
    """Tiny tensor -> zero-padded (rows, 128) f32 tile with rows % 8 == 0.

    Zero-padding BOTH pred and target keeps the squared-diff sum exact; the
    mean divides by the original element count in the wrapper.
    """
    n = int(math.prod(x.shape))
    rows = _round_up(max(pl.cdiv(n, _LANES), 1), 8)
    flat = x.reshape(-1).astype(jnp.float32)
    pad = rows * _LANES - n
    if pad:
        flat = jnp.pad(flat, (0, pad))
    return flat.reshape(rows, _LANES), n, rows


def _make_kernel(total_rows, block_rows, blocks_per_core, needs_mask,
                 dur_end, pit_end):
    """Kernel closure over static tiling constants.

    out_ref: (1, 4) f32 SMEM block (one row per core):
      [sum_sq(mel partial), sum_sq(duration), sum_sq(pitch), sum_sq(energy)]
    acc_ref: (block_rows, lane_dim) f32 VMEM accumulator for the mel stream.
    """

    def kernel(mel_ref, melt_ref, pred_ref, tgt_ref, out_ref, acc_ref):
        c = pl.program_id(0)   # core (parallel) axis
        i = pl.program_id(1)   # streaming (arbitrary) axis

        @pl.when(i == 0)
        def _():
            acc_ref[...] = jnp.zeros_like(acc_ref)

        # The three tiny losses: computed once, on core 0 / step 0.
        @pl.when((c == 0) & (i == 0))
        def _():
            diff = pred_ref[...] - tgt_ref[...]
            sq = diff * diff
            out_ref[0, 1] = jnp.sum(sq[:dur_end, :])
            out_ref[0, 2] = jnp.sum(sq[dur_end:pit_end, :])
            out_ref[0, 3] = jnp.sum(sq[pit_end:, :])

        # Other cores contribute zero for the small terms (rows summed later).
        @pl.when((c != 0) & (i == 0))
        def _():
            out_ref[0, 1] = jnp.float32(0.0)
            out_ref[0, 2] = jnp.float32(0.0)
            out_ref[0, 3] = jnp.float32(0.0)

        # Hot loop: pure VPU accumulation into a block-shaped f32 buffer; the
        # single cross-lane reduce happens only at the last step.
        d = mel_ref[...].astype(jnp.float32) - melt_ref[...].astype(jnp.float32)
        if needs_mask:
            row = ((c * blocks_per_core + i) * block_rows
                   + jax.lax.broadcasted_iota(jnp.int32, d.shape, 0))
            d = jnp.where(row < total_rows, d, jnp.float32(0.0))
        acc_ref[...] += d * d

        @pl.when(i == pl.num_programs(1) - 1)
        def _():
            out_ref[0, 0] = jnp.sum(acc_ref[...])

    return kernel


def fastspeech_loss(mel, duration_predicted, pitch_predicted, energy_predicted,
                    mel_target, duration_target, pitch_target, energy_target,
                    block_rows=None):
    assert mel.shape == mel_target.shape
    assert duration_predicted.shape == duration_target.shape
    assert pitch_predicted.shape == pitch_target.shape
    assert energy_predicted.shape == energy_target.shape

    # ---- big mel term: free 2-D reshape, NO padding copy --------------------
    mel2, n_mel = _big_as_2d(mel)
    melt2, _ = _big_as_2d(mel_target)
    total_rows, lane_dim = mel2.shape

    mult = max(_sublane_multiple(mel2.dtype), _sublane_multiple(melt2.dtype))
    itemsize = max(jnp.dtype(mel2.dtype).itemsize,
                   jnp.dtype(melt2.dtype).itemsize)
    lane_padded = _round_up(lane_dim, _LANES)
    per_row_bytes = lane_padded * (4 * itemsize + 4)
    auto_rows = max((_VMEM_BUDGET_BYTES // per_row_bytes) // mult * mult, mult)

    if block_rows is None:
        block_rows = auto_rows
    if block_rows >= total_rows:
        block_rows = total_rows  # whole array in one block (full-extent dim)
    else:
        assert block_rows % mult == 0, (
            f"block_rows must be a multiple of {mult} for dtype {mel2.dtype}")

    num_blocks = pl.cdiv(total_rows, block_rows)
    num_cores = 2 if num_blocks >= 2 else 1   # shard across v7x's 2 TCs
    blocks_per_core = pl.cdiv(num_blocks, num_cores)
    needs_mask = (num_cores * blocks_per_core * block_rows) != total_rows

    # ---- tiny duration / pitch / energy terms: two packed resident tiles ----
    dur_p, n_dur, r_dur = _small_tile_f32(duration_predicted)
    dur_t, _, _ = _small_tile_f32(duration_target)
    pit_p, n_pit, r_pit = _small_tile_f32(pitch_predicted)
    pit_t, _, _ = _small_tile_f32(pitch_target)
    en_p, n_en, r_en = _small_tile_f32(energy_predicted)
    en_t, _, _ = _small_tile_f32(energy_target)
    pred_stack = jnp.concatenate([dur_p, pit_p, en_p], axis=0)
    tgt_stack = jnp.concatenate([dur_t, pit_t, en_t], axis=0)
    dur_end = r_dur
    pit_end = r_dur + r_pit
    small_rows = r_dur + r_pit + r_en

    kernel = _make_kernel(total_rows, block_rows, blocks_per_core, needs_mask,
                          dur_end, pit_end)

    # Clamp keeps any padded (beyond-last) block index in-bounds; its data is
    # fully masked in the kernel so it contributes nothing.
    big_spec = pl.BlockSpec(
        (block_rows, lane_dim),
        lambda c, i: (jnp.minimum(c * blocks_per_core + i, num_blocks - 1), 0))
    small_spec = pl.BlockSpec((small_rows, _LANES), lambda c, i: (0, 0))

    bytes_accessed = (mel2.size * jnp.dtype(mel2.dtype).itemsize
                      + melt2.size * jnp.dtype(melt2.dtype).itemsize
                      + (pred_stack.size + tgt_stack.size) * 4
                      + num_cores * 4 * 4)
    cost = pl.CostEstimate(flops=3 * (mel2.size + pred_stack.size),
                           transcendentals=0,
                           bytes_accessed=bytes_accessed)

    partials = pl.pallas_call(
        kernel,
        out_shape=jax.ShapeDtypeStruct((num_cores, 4), jnp.float32),
        grid=(num_cores, blocks_per_core),
        in_specs=[big_spec, big_spec, small_spec, small_spec],
        out_specs=pl.BlockSpec((1, 4), lambda c, i: (c, 0),
                               memory_space=pltpu.SMEM),
        scratch_shapes=[pltpu.VMEM((block_rows, lane_dim), jnp.float32)],
        compiler_params=pltpu.CompilerParams(
            dimension_semantics=("parallel", "arbitrary")),
        cost_estimate=cost,
    )(mel2, melt2, pred_stack, tgt_stack)

    sums = jnp.sum(partials, axis=0)  # reduce the per-core partial rows
    # mean = sum / ORIGINAL element count (matches nn.MSELoss(reduction='mean'))
    return (sums[0] / jnp.float32(n_mel),
            sums[1] / jnp.float32(n_dur),
            sums[2] / jnp.float32(n_pit),
            sums[3] / jnp.float32(n_en))


def _reference(mel, dur_p, pit_p, en_p, mel_t, dur_t, pit_t, en_t):
    return (jnp.mean((mel - mel_t) ** 2),
            jnp.mean((dur_p - dur_t) ** 2),
            jnp.mean((pit_p - pit_t) ** 2),
            jnp.mean((en_p - en_t) ** 2))


def _check(got, ref):
    for g, r in zip(got, ref):
        assert jnp.allclose(g, r, rtol=1e-5, atol=1e-6), (g, r)


if __name__ == "__main__":
    def make_inputs(key, B, T, N):
        ks = jax.random.split(key, 8)
        return (jax.random.normal(ks[0], (B, T, N), jnp.float32),  # mel
                jax.random.normal(ks[1], (B, T), jnp.float32),     # dur pred
                jax.random.normal(ks[2], (B, T), jnp.float32),     # pitch pred
                jax.random.normal(ks[3], (B, T), jnp.float32),     # energy pred
                jax.random.normal(ks[4], (B, T, N), jnp.float32),  # mel target
                jax.random.normal(ks[5], (B, T), jnp.float32),     # dur target
                jax.random.normal(ks[6], (B, T), jnp.float32),     # pitch target
                jax.random.normal(ks[7], (B, T), jnp.float32))     # energy target

    # 1) Small module-typical shapes: single full-extent block, one core.
    args1 = make_inputs(jax.random.PRNGKey(0), 2, 8, 32)
    got1 = jax.block_until_ready(fastspeech_loss(*args1))
    _check(got1, _reference(*args1))

    # 2) Forced multi-block: streaming accumulator + 2-core split + ragged-tail
    #    masking on the lane-dense (n/128, 128) path.
    args2 = make_inputs(jax.random.PRNGKey(1), 2, 16, 80)
    got2 = jax.block_until_ready(fastspeech_loss(*args2, block_rows=8))
    _check(got2, _reference(*args2))

    # 3) Element count NOT divisible by 128: last-dim-as-lane layout (C=80),
    #    multi-block, clamped padded block on core 1, in-kernel row masking.
    args3 = make_inputs(jax.random.PRNGKey(2), 2, 37, 80)
    got3 = jax.block_until_ready(fastspeech_loss(*args3, block_rows=16))
    _check(got3, _reference(*args3))

    print("KERNEL_OK")
</pallas_src>

<mosaic_0001>
module attributes {stable_mosaic.version = 11 : i64} {
  func.func @kernel(%arg0: i32, %arg1: i32, %arg2: memref<4x128xf32, #tpu.memory_space<vmem>>, %arg3: memref<4x128xf32, #tpu.memory_space<vmem>>, %arg4: memref<24x128xf32, #tpu.memory_space<vmem>>, %arg5: memref<24x128xf32, #tpu.memory_space<vmem>>, %arg6: memref<1x4xf32, #tpu.memory_space<smem>>, %arg7: memref<4x128xf32, #tpu.memory_space<vmem>>) attributes {dimension_semantics = [#tpu.dimension_semantics<parallel>, #tpu.dimension_semantics<arbitrary>], iteration_bounds = array<i64: 1, 1>, scalar_prefetch = 0 : i64, scratch_operands = 1 : i64, tpu.core_type = #tpu.core_type<tc>, window_params = [{transform_indices = @transform_0, window_bounds = array<i64: 4, 128>}, {transform_indices = @transform_1, window_bounds = array<i64: 4, 128>}, {pipeline_mode = #tpu.pipeline_mode<synchronous>, transform_indices = @transform_2, window_bounds = array<i64: 24, 128>}, {pipeline_mode = #tpu.pipeline_mode<synchronous>, transform_indices = @transform_3, window_bounds = array<i64: 24, 128>}, {transform_indices = @transform_4, window_bounds = array<i64: 1, 4>}]} {
    %c0_i32 = arith.constant 0 : i32
    %0 = arith.cmpi eq, %arg1, %c0_i32 : i32
    %1 = arith.extui %0 : i1 to i32
    %c0_i32_0 = arith.constant 0 : i32
    %2 = arith.cmpi ne, %1, %c0_i32_0 : i32
    scf.if %2 {
      %cst = arith.constant 0.000000e+00 : f32
      %23 = vector.broadcast %cst : f32 to vector<4x128xf32>
      %c0_16 = arith.constant 0 : index
      %c0_17 = arith.constant 0 : index
      %24 = vector.load %arg7[%c0_16, %c0_17] : memref<4x128xf32, #tpu.memory_space<vmem>>, vector<4x128xf32>
      tpu.vector_store %arg7[%c0_16, %c0_17], %23 {strides = array<i32>} : memref<4x128xf32, #tpu.memory_space<vmem>>, vector<4x128xf32>,
    } else {
    }
    %c0_i32_1 = arith.constant 0 : i32
    %3 = arith.cmpi eq, %arg0, %c0_i32_1 : i32
    %c0_i32_2 = arith.constant 0 : i32
    %4 = arith.cmpi eq, %arg1, %c0_i32_2 : i32
    %5 = arith.andi %3, %4 : i1
    %6 = arith.extui %5 : i1 to i32
    %c0_i32_3 = arith.constant 0 : i32
    %7 = arith.cmpi ne, %6, %c0_i32_3 : i32
    scf.if %7 {
      %c0_16 = arith.constant 0 : index
      %c0_17 = arith.constant 0 : index
      %23 = vector.load %arg4[%c0_16, %c0_17] : memref<24x128xf32, #tpu.memory_space<vmem>>, vector<24x128xf32>
      %c0_18 = arith.constant 0 : index
      %c0_19 = arith.constant 0 : index
      %24 = vector.load %arg5[%c0_18, %c0_19] : memref<24x128xf32, #tpu.memory_space<vmem>>, vector<24x128xf32>
      %25 = arith.subf %23, %24 : vector<24x128xf32>
      %26 = arith.mulf %25, %25 : vector<24x128xf32>
      %27 = vector.extract_strided_slice %26 {offsets = [0, 0], sizes = [8, 128], strides = [1, 1]} : vector<24x128xf32> to vector<8x128xf32>
      %28 = vector.shape_cast %27 : vector<8x128xf32> to vector<1x8x128xf32>
      %cst = arith.constant dense<0.000000e+00> : vector<1xf32>
      %29 = vector.multi_reduction <add>, %28, %cst [1, 2] : vector<1x8x128xf32> to vector<1xf32>
      %30 = vector.shape_cast %29 : vector<1xf32> to vector<1x1x1xf32>
      %31 = vector.extract %30[0, 0, 0] : f32 from vector<1x1x1xf32>
      %c0_20 = arith.constant 0 : index
      %c1 = arith.constant 1 : index
      %32 = memref.load %arg6[%c0_20, %c1] : memref<1x4xf32, #tpu.memory_space<smem>>
      memref.store %31, %arg6[%c0_20, %c1] : memref<1x4xf32, #tpu.memory_space<smem>>
      %33 = vector.extract_strided_slice %26 {offsets = [8, 0], sizes = [8, 128], strides = [1, 1]} : vector<24x128xf32> to vector<8x128xf32>
      %34 = vector.shape_cast %33 : vector<8x128xf32> to vector<1x8x128xf32>
      %cst_21 = arith.constant dense<0.000000e+00> : vector<1xf32>
      %35 = vector.multi_reduction <add>, %34, %cst_21 [1, 2] : vector<1x8x128xf32> to vector<1xf32>
      %36 = vector.shape_cast %35 : vector<1xf32> to vector<1x1x1xf32>
      %37 = vector.extract %36[0, 0, 0] : f32 from vector<1x1x1xf32>
      %c0_22 = arith.constant 0 : index
      %c2 = arith.constant 2 : index
      %38 = memref.load %arg6[%c0_22, %c2] : memref<1x4xf32, #tpu.memory_space<smem>>
      memref.store %37, %arg6[%c0_22, %c2] : memref<1x4xf32, #tpu.memory_space<smem>>
      %39 = vector.extract_strided_slice %26 {offsets = [16, 0], sizes = [8, 128], strides = [1, 1]} : vector<24x128xf32> to vector<8x128xf32>
      %40 = vector.shape_cast %39 : vector<8x128xf32> to vector<1x8x128xf32>
      %cst_23 = arith.constant dense<0.000000e+00> : vector<1xf32>
      %41 = vector.multi_reduction <add>, %40, %cst_23 [1, 2] : vector<1x8x128xf32> to vector<1xf32>
      %42 = vector.shape_cast %41 : vector<1xf32> to vector<1x1x1xf32>
      %43 = vector.extract %42[0, 0, 0] : f32 from vector<1x1x1xf32>
      %c0_24 = arith.constant 0 : index
      %c3 = arith.constant 3 : index
      %44 = memref.load %arg6[%c0_24, %c3] : memref<1x4xf32, #tpu.memory_space<smem>>
      memref.store %43, %arg6[%c0_24, %c3] : memref<1x4xf32, #tpu.memory_space<smem>>
    } else {
    }
    %c0_i32_4 = arith.constant 0 : i32
    %8 = arith.cmpi ne, %arg0, %c0_i32_4 : i32
    %c0_i32_5 = arith.constant 0 : i32
    %9 = arith.cmpi eq, %arg1, %c0_i32_5 : i32
    %10 = arith.andi %8, %9 : i1
    %11 = arith.extui %10 : i1 to i32
    %c0_i32_6 = arith.constant 0 : i32
    %12 = arith.cmpi ne, %11, %c0_i32_6 : i32
    scf.if %12 {
      %cst = arith.constant 0.000000e+00 : f32
      %c0_16 = arith.constant 0 : index
      %c1 = arith.constant 1 : index
      %23 = memref.load %arg6[%c0_16, %c1] : memref<1x4xf32, #tpu.memory_space<smem>>
      memref.store %cst, %arg6[%c0_16, %c1] : memref<1x4xf32, #tpu.memory_space<smem>>
      %cst_17 = arith.constant 0.000000e+00 : f32
      %c0_18 = arith.constant 0 : index
      %c2 = arith.constant 2 : index
      %24 = memref.load %arg6[%c0_18, %c2] : memref<1x4xf32, #tpu.memory_space<smem>>
      memref.store %cst_17, %arg6[%c0_18, %c2] : memref<1x4xf32, #tpu.memory_space<smem>>
      %cst_19 = arith.constant 0.000000e+00 : f32
      %c0_20 = arith.constant 0 : index
      %c3 = arith.constant 3 : index
      %25 = memref.load %arg6[%c0_20, %c3] : memref<1x4xf32, #tpu.memory_space<smem>>
      memref.store %cst_19, %arg6[%c0_20, %c3] : memref<1x4xf32, #tpu.memory_space<smem>>
    } else {
    }
    %c0 = arith.constant 0 : index
    %c0_7 = arith.constant 0 : index
    %13 = vector.load %arg2[%c0, %c0_7] : memref<4x128xf32, #tpu.memory_space<vmem>>, vector<4x128xf32>
    %c0_8 = arith.constant 0 : index
    %c0_9 = arith.constant 0 : index
    %14 = vector.load %arg3[%c0_8, %c0_9] : memref<4x128xf32, #tpu.memory_space<vmem>>, vector<4x128xf32>
    %15 = arith.subf %13, %14 : vector<4x128xf32>
    %c0_10 = arith.constant 0 : index
    %c0_11 = arith.constant 0 : index
    %16 = vector.load %arg7[%c0_10, %c0_11] : memref<4x128xf32, #tpu.memory_space<vmem>>, vector<4x128xf32>
    %17 = arith.mulf %15, %15 : vector<4x128xf32>
    %18 = arith.addf %16, %17 : vector<4x128xf32>
    %c0_12 = arith.constant 0 : index
    %c0_13 = arith.constant 0 : index
    %19 = vector.load %arg7[%c0_12, %c0_13] : memref<4x128xf32, #tpu.memory_space<vmem>>, vector<4x128xf32>
    tpu.vector_store %arg7[%c0_12, %c0_13], %18 {strides = array<i32>} : memref<4x128xf32, #tpu.memory_space<vmem>>, vector<4x128xf32>,
    %c0_i32_14 = arith.constant 0 : i32
    %20 = arith.cmpi eq, %arg1, %c0_i32_14 : i32
    %21 = arith.extui %20 : i1 to i32
    %c0_i32_15 = arith.constant 0 : i32
    %22 = arith.cmpi ne, %21, %c0_i32_15 : i32
    scf.if %22 {
      %c0_16 = arith.constant 0 : index
      %c0_17 = arith.constant 0 : index
      %23 = vector.load %arg7[%c0_16, %c0_17] : memref<4x128xf32, #tpu.memory_space<vmem>>, vector<4x128xf32>
      %24 = vector.shape_cast %23 : vector<4x128xf32> to vector<1x4x128xf32>
      %cst = arith.constant dense<0.000000e+00> : vector<1xf32>
      %25 = vector.multi_reduction <add>, %24, %cst [1, 2] : vector<1x4x128xf32> to vector<1xf32>
      %26 = vector.shape_cast %25 : vector<1xf32> to vector<1x1x1xf32>
      %27 = vector.extract %26[0, 0, 0] : f32 from vector<1x1x1xf32>
      %c0_18 = arith.constant 0 : index
      %c0_19 = arith.constant 0 : index
      %28 = memref.load %arg6[%c0_18, %c0_19] : memref<1x4xf32, #tpu.memory_space<smem>>
      memref.store %27, %arg6[%c0_18, %c0_19] : memref<1x4xf32, #tpu.memory_space<smem>>
    } else {
    }
    return
  }
  func.func @transform_0(%arg0: i32, %arg1: i32) -> (i32, i32) {
    %c1_i32 = arith.constant 1 : i32
    %0 = arith.muli %arg0, %c1_i32 : i32
    %1 = arith.addi %0, %arg1 : i32
    %c0_i32 = arith.constant 0 : i32
    %2 = arith.minsi %1, %c0_i32 : i32
    %c0_i32_0 = arith.constant 0 : i32
    %c0_i32_1 = arith.constant 0 : i32
    return %2, %c0_i32_0 : i32, i32
  }
  func.func @transform_1(%arg0: i32, %arg1: i32) -> (i32, i32) {
    %c1_i32 = arith.constant 1 : i32
    %0 = arith.muli %arg0, %c1_i32 : i32
    %1 = arith.addi %0, %arg1 : i32
    %c0_i32 = arith.constant 0 : i32
    %2 = arith.minsi %1, %c0_i32 : i32
    %c0_i32_0 = arith.constant 0 : i32
    %c0_i32_1 = arith.constant 0 : i32
    return %2, %c0_i32_0 : i32, i32
  }
  func.func @transform_2(%arg0: i32, %arg1: i32) -> (i32, i32) {
    %c0_i32 = arith.constant 0 : i32
    %c0_i32_0 = arith.constant 0 : i32
    %c0_i32_1 = arith.constant 0 : i32
    return %c0_i32, %c0_i32_0 : i32, i32
  }
  func.func @transform_3(%arg0: i32, %arg1: i32) -> (i32, i32) {
    %c0_i32 = arith.constant 0 : i32
    %c0_i32_0 = arith.constant 0 : i32
    %c0_i32_1 = arith.constant 0 : i32
    return %c0_i32, %c0_i32_0 : i32, i32
  }
  func.func @transform_4(%arg0: i32, %arg1: i32) -> (i32, i32) {
    %c0_i32 = arith.constant 0 : i32
    %c0_i32_0 = arith.constant 0 : i32
    return %arg0, %c0_i32 : i32, i32
  }
}

</mosaic_0001>

<bundles_post_ra>
// kernel: tpu_custom_call.1
= control target key start
LH: loop header
LB: loop body
LE: loop exit
PB: predicated region body
PF: predicated region fallthrough
CT: control target
= control target key end

     0   :  { %9 = vsyncpa [#allocation4], 0  ;;  %s355_s0 = inlined_call_operand.hbm [shape: f32[4,128], index: 0, kind: input, shape index: {}]   ;;  %s356_s1 = inlined_call_operand.hbm [shape: f32[4,128], index: 1, kind: input, shape index: {}]   ;;  %s357_s2 = inlined_call_operand.hbm [shape: f32[24,128], index: 2, kind: input, shape index: {}]   ;;  %s358_s3 = inlined_call_operand.hbm [shape: f32[24,128], index: 3, kind: input, shape index: {}]   ;;  %s359_s4 = inlined_call_operand.hbm [shape: f32[1,4], index: 4, kind: output, shape index: {}]  }
   0x1   :  { %10 = vsyncpa [#allocation7], 0 }
   0x2   :  { %11 = vsyncpa [#allocation10], 0 }
   0x3   :  { %12 = vsyncpa [#allocation5], 0  ;;  %s307_s15 = smov [#allocation6]   ;;  %s308_s17 = smov [#allocation3]  }
   0x4   :  { %s39_s16 = sshll.u32 %s307_s15, 4  ;;  %s24_s18 = sshll.u32 %s308_s17, 4  ;;  %s40_s16 = int_to_ptr.vmem [resolvable:$true] %s39_s16  ;;  %s25_s18 = int_to_ptr.vmem [resolvable:$true] %s24_s18 }
   0x5   :  { %s219_s19 = scalar_lea.vmem %s40_s16, 64  ;;  %p224_p1 = scmp.lt.s32.totalorder %s40_s16, %s40_s16 }
   0x6   :  { %p220_p0 = scmp.ne.s32.totalorder %s40_s16, %s219_s19  ;;  %p225_p2 = scmp.lt.s32.totalorder %s219_s19, %s219_s19 }
   0x8   :  { %p226_p3 = por %p225_p2, %p224_p1 }
   0xa   :  { %p227_p4 = pnand %p226_p3, %p220_p0 }
   0xc   :  { %230 = shalt.err (!%p227_p4)
}
   0xd   :  { %42 = dma.hbm_to_vmem [thread:$0]  %s356_s1, 64, %s40_s16, [#allocation7]  }
   0xe   :  { %s239_s22 = scalar_lea.vmem %s25_s18, 64  ;;  %p244_p6 = scmp.lt.s32.totalorder %s25_s18, %s25_s18 }
   0xf   :  { %p240_p5 = scmp.ne.s32.totalorder %s25_s18, %s239_s22  ;;  %p245_p7 = scmp.lt.s32.totalorder %s239_s22, %s239_s22 }
  0x11   :  { %p246_p8 = por %p245_p7, %p244_p6 }
  0x13   :  { %p247_p9 = pnand %p246_p8, %p240_p5 }
  0x15   :  { %250 = shalt.err (!%p247_p9)
}
  0x16   :  { %27 = dma.hbm_to_vmem [thread:$0]  %s355_s0, 64, %s25_s18, [#allocation4]  }
  0x17   :  { %s309_s25 = smov [#allocation8]  }
  0x18   :  { %s48_s26 = sshll.u32 %s309_s25, 4  ;;  %s49_s26 = int_to_ptr.vmem [resolvable:$true] %s48_s26 }
  0x19   :  { %s259_s27 = scalar_lea.vmem %s49_s26, 384  ;;  %p264_p11 = scmp.lt.s32.totalorder %s49_s26, %s49_s26 }
  0x1a   :  { %p260_p10 = scmp.ne.s32.totalorder %s49_s26, %s259_s27  ;;  %p265_p12 = scmp.lt.s32.totalorder %s259_s27, %s259_s27 }
  0x1c   :  { %p266_p13 = por %p265_p12, %p264_p11 }
  0x1e   :  { %p267_p0 = pnand %p266_p13, %p260_p10 }
  0x20   :  { %270 = shalt.err (!%p267_p0)
}
  0x21   :  { %s310_s1 = smov 128   ;;  %s311_s28 = smov 8  }
  0x22   :  { %54 = dma.hbm_to_vmem [thread:$0]  %s357_s2, 384, %s49_s26, [#allocation7], %s310_s1, %s310_s1, %s311_s28  }
  0x23   :  { %s312_s5 = smov [#allocation9]  }
  0x24   :  { %s60_s6 = sshll.u32 %s312_s5, 4  ;;  %s61_s6 = int_to_ptr.vmem [resolvable:$true] %s60_s6 }
  0x25   :  { %s279_s0 = scalar_lea.vmem %s61_s6, 384  ;;  %p284_p2 = scmp.lt.s32.totalorder %s61_s6, %s61_s6 }
  0x26   :  { %p280_p1 = scmp.ne.s32.totalorder %s61_s6, %s279_s0  ;;  %p285_p3 = scmp.lt.s32.totalorder %s279_s0, %s279_s0 }
  0x28   :  { %p286_p4 = por %p285_p3, %p284_p2 }
  0x2a   :  { %p287_p5 = pnand %p286_p4, %p280_p1 }
  0x2c   :  { %290 = shalt.err (!%p287_p5)
}
  0x2d   :  { %66 = dma.hbm_to_vmem [thread:$0]  %s358_s3, 384, %s61_s6, [#allocation10], %s310_s1, %s310_s1, %s311_s28  }
  0x2e   :  { %299 = dma.done.wait [#allocation4], 64  }
  0x2f   :  { %300 = vsyncadd [#allocation4], 4294967232 }
  0x30   :  { %301 = dma.done.wait [#allocation7], 448  }
  0x31   :  { %302 = vsyncadd [#allocation7], 4294966848 }
  0x32   :  { %303 = dma.done.wait [#allocation10], 384  }
  0x33   :  { %304 = vsyncadd [#allocation10], 4294966912  ;;  %v313_v0 = vmov 0.0   ;;  %v95_v1 = vld [vmem:[#allocation8] sm:$0xff]  ;;  %v98_v2 = vld [vmem:[#allocation9] sm:$0xff]  ;;  %vm162_vm0 = vcmask 1043456  }
  0x34   :  { %89 = vst [vmem:[#allocation2] sm:$0xf] %v313_v0  ;;  %v97_v3 = vld [vmem:[#allocation8 + $0x10] sm:$0xff]  ;;  %v101_v4 = vsub.f32 %v95_v1, %v98_v2  ;;  %v100_v5 = vld [vmem:[#allocation9 + $0x10] sm:$0xff]  ;;  %v99_v7 = vld [vmem:[#allocation9 + $0x8] sm:$0xff]  ;;  %s314_s11 = smov [#allocation11]  }
  0x35   :  { %v96_v6 = vld [vmem:[#allocation8 + $0x8] sm:$0xff]  ;;  %v103_v8 = vsub.f32 %v97_v3, %v100_v5  ;;  %v151_v10 = vld [vmem:[#allocation3] sm:$0xf]  ;;  %v152_v11 = vld [vmem:[#allocation6] sm:$0xf] }
  0x36   :  { %v102_v9 = vsub.f32 %v96_v6, %v99_v7  ;;  %v104_v12 = vmul.f32 %v101_v4, %v101_v4  ;;  %v153_v13 = vsub.f32 %v151_v10, %v152_v11 }
  0x37   :  { %v106_v14 = vmul.f32 %v103_v8, %v103_v8 }
  0x38   :  { %107 = vadd.xlane.f32.xlu0 %v104_v12  ;;  %v105_v16 = vmul.f32 %v102_v9, %v102_v9  ;;  %v155_v17 = vmul.f32 %v153_v13, %v153_v13 }
  0x39   :  { %129 = vadd.xlane.f32.xlu1 %v106_v14 }
  0x3b   :  { %v154_v15 = vld [vmem:[#allocation2] sm:$0xf] }
  0x3c   :  { %v156_v18 = vadd.f32 %v155_v17, %v154_v15  ;;  %118 = vadd.xlane.f32.xlu0 %v105_v16 }
  0x3e   :  { %157 = vst [vmem:[#allocation2] sm:$0xf] %v156_v18 }
  0x45   :  { %v161_v19 = vld [vmem:[#allocation2] sm:$0xf] }
  0x46   :  { %v163_v20 = vsel %vm162_vm0, %v161_v19, 0.0 }
  0x47   :  { %164 = vadd.xlane.f32.xlu1 %v163_v20 }
  0xc1   :  { %v108_v21 = vpop.xlane.xlu0 %107 }
  0xc2   :  { %v109_v22 = vrot.slane %v108_v21, 4  ;;  %v130_v23 = vpop.xlane.xlu1 %129 }
  0xc3   :  { %v131_v24 = vrot.slane %v130_v23, 4 }
  0xc4   :  { %v110_v25 = vadd.f32 %v109_v22, %v108_v21 }
  0xc5   :  { %v132_v26 = vadd.f32 %v131_v24, %v130_v23  ;;  %v119_v27 = vpop.xlane.xlu0 %118 }
  0xc6   :  { %v111_v28 = vrot.slane %v110_v25, 2  ;;  %v120_v29 = vrot.slane %v119_v27, 4 }
  0xc7   :  { %v133_v30 = vrot.slane %v132_v26, 2 }
  0xc8   :  { %v121_v31 = vadd.f32 %v120_v29, %v119_v27  ;;  %v112_v32 = vadd.f32 %v111_v28, %v110_v25 }
  0xc9   :  { %v134_v33 = vadd.f32 %v133_v30, %v132_v26 }
  0xca   :  { %v122_v34 = vrot.slane %v121_v31, 2  ;;  %v113_v35 = vrot.slane %v112_v32, 1 }
  0xcb   :  { %v135_v38 = vrot.slane %v134_v33, 1 }
  0xcc   :  { %v123_v36 = vadd.f32 %v122_v34, %v121_v31  ;;  %v114_v37 = vadd.f32 %v113_v35, %v112_v32 }
  0xcd   :  { %v136_v44 = vadd.f32 %v135_v38, %v134_v33 }
  0xce   :  { %195 = vpush %v114_v37  ;;  %v124_v40 = vrot.slane %v123_v36, 1 }
  0xd0   :  { %v165_v39 = vpop.xlane.xlu1 %164  ;;  %v125_v42 = vadd.f32 %v124_v40, %v123_v36 }
  0xd1   :  { %v166_v41 = vrot.slane %v165_v39, 4 }
  0xd2   :  { %197 = vpush %v125_v42 }
  0xd3   :  { %v167_v43 = vadd.f32 %v166_v41, %v165_v39  ;;  %199 = vpush %v136_v44 }
  0xd5   :  { %v168_v45 = vrot.slane %v167_v43, 2 }
  0xd7   :  { %v169_v46 = vadd.f32 %v168_v45, %v167_v43 }
  0xd9   :  { %v170_v47 = vrot.slane %v169_v46, 1 }
  0xdb   :  { %v171_v48 = vadd.f32 %v170_v47, %v169_v46 }
  0xdd   :  { %201 = vpush %v171_v48 }
  0xff   :  { %s196_s2 = spop %195 }
 0x100   :  { %117 = sst [smem:[#allocation11 + $0x1]] %s196_s2 }
 0x103   :  { %s198_s3 = spop %197 }
 0x104   :  { %128 = sst [smem:[#allocation11 + $0x2]] %s198_s3  ;;  %s200_s9 = spop %199 }
 0x105   :  { %139 = sst [smem:[#allocation11 + $0x3]] %s200_s9 }
 0x10e   :  { %s202_s10 = spop %201 }
 0x10f   :  { %174 = sst [smem:[#allocation11]] %s202_s10 }
 0x110   :  { %182 = dma.smem_to_hbm %s314_s11, 16, %s359_s4, [#allocation5]  }
 0x111   :  { %305 = dma.done.wait [#allocation5], 16  }
 0x112   :  { %306 = vsyncadd [#allocation5], 4294967280 }
 0x113   :  { %186 = sfence }
 0x114   :  { %187 = vsyncpa [#allocation4], 1 }
 0x115   :  { %188 = vsyncpa [#allocation7], 1 }
 0x116   :  { %189 = vsyncpa [#allocation10], 1 }
 0x117   :  { %190 = vsyncpa [#allocation5], 1 }

</bundles_post_ra>
